<compile_context>
chip_gen: v5e
topology: v5e:2x2
jax: 0.10.0
libtpu: 0.0.40
codegen_flags: <defaults>
</compile_context>

<pallas_src>
import functools

import jax
import jax.numpy as jnp
from jax.experimental import pallas as pl
from jax.experimental.pallas import tpu as pltpu


_MAX_ROWS_PER_TILE = 2048               # 2048 rows x 128 lanes = 256K pixels
_INPUT_VMEM_BUDGET = 16 * 1024 * 1024   # for the double-buffered input blocks


def _dice_sums_kernel(x_ref, t_ref, o_ref, *, num_classes, rows_tile,
                      tiles_per_split, total_rows, needs_mask):
    s = pl.program_id(0)          # TensorCore split (v7x, N == 1)
    j = pl.program_id(2)          # pixel-row tile (reduction axis, innermost)

    # Zero the resident per-(split, batch) accumulator at the start of the
    # pixel-reduction loop.
    @pl.when(j == 0)
    def _():
        o_ref[...] = jnp.zeros_like(o_ref)

    c = num_classes
    t = t_ref[0]                                           # (rows, 128) int

    if needs_mask:
        # Only the last rows-tile of the grid can overhang the array; mask it
        # with a row-level predicate (static Python gate, cheap: iota+add+cmp).
        row = jax.lax.broadcasted_iota(jnp.int32, (rows_tile, 128), 0)
        start = (s * tiles_per_split + j) * rows_tile
        valid = (start + row) < total_rows                 # (rows, 128) bool
        t = jnp.where(valid, t, 0)                         # class 0 never used

    # Dense per-channel (rows, 128) slabs; softmax over channels is a short
    # Python loop of elementwise VPU ops (no cross-sublane work).
    xs = []
    for i in range(c):
        xi = x_ref[0, i].astype(jnp.float32)
        if needs_mask:
            xi = jnp.where(valid, xi, 0.0)   # keep exp / reciprocal finite
        xs.append(xi)

    m = xs[0]
    for i in range(1, c):
        m = jnp.maximum(m, xs[i])
    es = [jnp.exp(xi - m) for xi in xs]
    ssum = es[0]
    for i in range(1, c):
        ssum = ssum + es[i]
    inv = pl.reciprocal(ssum, approx=False)  # exact: matches reference softmax

    # Pack per-class [intersect, prob_sum, tgt_cnt] into lanes 0..2 of row i
    # of a (C, 128) slab resident in the output block (class 0 row stays 0).
    row_id = jax.lax.broadcasted_iota(jnp.int32, (c, 128), 0)
    lane_id = jax.lax.broadcasted_iota(jnp.int32, (c, 128), 1)
    part = jnp.zeros((c, 128), jnp.float32)
    for i in range(1, c):                    # class-0 statistics are unused
        p_i = es[i] * inv                    # softmax prob of class i
        if needs_mask:
            p_i = jnp.where(valid, p_i, 0.0)
        oh_i = (t == i).astype(jnp.float32)  # scalar-vs-vector compare, no iota
        inter = jnp.sum(p_i * oh_i)
        psum = jnp.sum(p_i)
        tcnt = jnp.sum(oh_i)
        is_row = row_id == i
        part = part + jnp.where(is_row & (lane_id == 0), inter, 0.0)
        part = part + jnp.where(is_row & (lane_id == 1), psum, 0.0)
        part = part + jnp.where(is_row & (lane_id == 2), tcnt, 0.0)

    o_ref[0, 0] += part


def _dice_sums(x4, t3, num_classes):
    """x4: (N, C, R, 128) logits; t3: (N, R, 128) int labels.

    Returns (splits, N, C, 128) f32; row i, lanes 0..2 hold
    [intersect_i, prob_sum_i, tgt_cnt_i] (class 0 row is zero).
    """
    n, c, total_rows, lane = x4.shape
    assert lane == 128 and c == num_classes

    # Rows per grid step: as large as the (double-buffered) input blocks allow,
    # capped at 256K pixels (safe even on v7x's 64 MiB VMEM / v5e's 16 MiB
    # default scoped VMEM).
    bytes_per_row = 2 * 128 * (c * x4.dtype.itemsize + t3.dtype.itemsize)
    rows_cap = min(_MAX_ROWS_PER_TILE, _INPUT_VMEM_BUDGET // bytes_per_row)
    rows_cap = max(8, (rows_cap // 8) * 8)
    rows_tile = total_rows if total_rows <= rows_cap else rows_cap
    grid_r = pl.cdiv(total_rows, rows_tile)
    needs_mask = (grid_r * rows_tile) != total_rows

    # v7x has 2 TensorCores: with a single image, split the pixel reduction
    # across a leading "parallel" axis so both cores get work (partials are
    # summed in the wrapper).  No effect on v5e/v6e (1 TC).
    splits = 2 if (n == 1 and grid_r >= 2 and grid_r % 2 == 0) else 1
    tiles_per_split = grid_r // splits

    kernel = functools.partial(
        _dice_sums_kernel, num_classes=c, rows_tile=rows_tile,
        tiles_per_split=tiles_per_split, total_rows=total_rows,
        needs_mask=needs_mask)

    return pl.pallas_call(
        kernel,
        out_shape=jax.ShapeDtypeStruct((splits, n, c, 128), jnp.float32),
        grid_spec=pltpu.PrefetchScalarGridSpec(
            num_scalar_prefetch=0,
            grid=(splits, n, tiles_per_split),
            in_specs=[
                pl.BlockSpec((1, c, rows_tile, 128),
                             lambda s, b, j: (b, 0, s * tiles_per_split + j, 0)),
                pl.BlockSpec((1, rows_tile, 128),
                             lambda s, b, j: (b, s * tiles_per_split + j, 0)),
            ],
            out_specs=pl.BlockSpec((1, 1, c, 128),
                                   lambda s, b, j: (s, b, 0, 0)),
        ),
        compiler_params=pltpu.CompilerParams(
            dimension_semantics=("parallel", "parallel", "arbitrary"),
            vmem_limit_bytes=32 * 1024 * 1024),
    )(x4, t3)


def dice_loss(logits_nchw: jax.Array, target_nhw: jax.Array,
              class_num: int = 3, smooth: float = 0.001) -> jax.Array:
    """Pallas implementation of DiceLoss.forward. Returns shape (1,) float32."""
    n, c, h, w = logits_nchw.shape
    assert c == class_num
    hw = h * w
    hw_pad = ((hw + 127) // 128) * 128

    x = logits_nchw.reshape(n, c, hw)
    t = target_nhw
    if not jnp.issubdtype(t.dtype, jnp.integer):
        t = t.astype(jnp.int32)        # keep integer labels narrow (no cast pass)
    t = t.reshape(n, hw)

    if hw_pad != hw:
        # "Safe" pad: +big logit on class 0, -big elsewhere, label 0.  Padded
        # pixels then contribute exactly zero to every class>=1 statistic
        # (softmax prob underflows to 0, one-hot is 0), so the kernel needs no
        # lane-level masking.  Only touched when HW is not a multiple of 128.
        pad = hw_pad - hw
        xpad = jnp.full((n, c, pad), -1e4, x.dtype).at[:, 0, :].set(1e4)
        x = jnp.concatenate([x, xpad], axis=-1)
        t = jnp.concatenate([t, jnp.zeros((n, pad), t.dtype)], axis=-1)

    rows = hw_pad // 128
    x4 = x.reshape(n, c, rows, 128)    # free: NCHW is already pixel-minor
    t3 = t.reshape(n, rows, 128)

    sums = _dice_sums(x4, t3, class_num)       # (splits, N, C, 128)
    totals = jnp.sum(sums, axis=(0, 1))        # (C, 128)
    intersect = totals[:, 0]                   # (C,)
    prob_sum = totals[:, 1]                    # (C,)
    tgt_cnt = totals[:, 2]                     # (C,)

    smooth = jnp.float32(smooth)
    dice_total = jnp.float32(0.0)
    for i in range(1, class_num):
        union = prob_sum[i] + tgt_cnt[i]
        dice_i = jnp.where(
            tgt_cnt[i] == 0,
            jnp.float32(1.0),
            (2.0 * intersect[i] + smooth) / (union + smooth),
        )
        dice_total = dice_total + dice_i

    loss = 1.0 - dice_total / (class_num - 1)
    return jnp.reshape(loss, (1,)).astype(jnp.float32)


def _dice_loss_ref(logits_nchw, target_nhw, class_num=3, smooth=0.001):
    """Pure-JAX reference mirroring the PyTorch code, for a sanity check."""
    p = jax.nn.softmax(logits_nchw.astype(jnp.float32), axis=1)
    dice_total = jnp.float32(0.0)
    for i in range(1, class_num):
        p_i = p[:, i, :, :]
        t_i = (target_nhw == i).astype(jnp.float32)
        intersect = jnp.sum(p_i * t_i)
        union = jnp.sum(p_i) + jnp.sum(t_i)
        dice_i = jnp.where(jnp.sum(t_i) == 0, 1.0,
                           (2 * intersect + smooth) / (union + smooth))
        dice_total = dice_total + dice_i
    return jnp.reshape(1.0 - dice_total / (class_num - 1), (1,))


if __name__ == "__main__":
    key = jax.random.PRNGKey(0)
    k1, k2 = jax.random.split(key)

    N, C, H, W = 2, 3, 16, 16  # class_num = 3 (module default)
    logits = jax.random.normal(k1, (N, C, H, W), dtype=jnp.float32)
    target = jax.random.randint(k2, (N, H, W), 0, C, dtype=jnp.int32)

    fn = jax.jit(functools.partial(dice_loss, class_num=C))
    out = jax.block_until_ready(fn(logits, target))

    ref = _dice_loss_ref(logits, target, class_num=C)
    assert out.shape == (1,)
    assert jnp.allclose(out, ref, atol=1e-5, rtol=1e-5), (out, ref)

    print("KERNEL_OK")
</pallas_src>

<mosaic_0001>
module attributes {stable_mosaic.version = 11 : i64} {
  func.func @_dice_sums_kernel(%arg0: i32, %arg1: i32, %arg2: i32, %arg3: memref<1x3x2x128xf32, #tpu.memory_space<vmem>>, %arg4: memref<1x2x128xi32, #tpu.memory_space<vmem>>, %arg5: memref<1x1x3x128xf32, #tpu.memory_space<vmem>>) attributes {dimension_semantics = [#tpu.dimension_semantics<parallel>, #tpu.dimension_semantics<parallel>, #tpu.dimension_semantics<arbitrary>], iteration_bounds = array<i64: 1, 2, 1>, scalar_prefetch = 0 : i64, scratch_operands = 0 : i64, tpu.core_type = #tpu.core_type<tc>, window_params = [{transform_indices = @transform_0, window_bounds = array<i64: 1, 3, 2, 128>}, {transform_indices = @transform_1, window_bounds = array<i64: 1, 2, 128>}, {transform_indices = @transform_2, window_bounds = array<i64: 1, 1, 3, 128>}]} {
    %c0_i32 = arith.constant 0 : i32
    %0 = arith.cmpi eq, %arg2, %c0_i32 : i32
    %1 = arith.extui %0 : i1 to i32
    %c0_i32_0 = arith.constant 0 : i32
    %2 = arith.cmpi ne, %1, %c0_i32_0 : i32
    scf.if %2 {
      %cst_41 = arith.constant 0.000000e+00 : f32
      %113 = vector.broadcast %cst_41 : f32 to vector<1x1x3x128xf32>
      %c0_42 = arith.constant 0 : index
      %c0_43 = arith.constant 0 : index
      %c0_44 = arith.constant 0 : index
      %c0_45 = arith.constant 0 : index
      %114 = vector.load %arg5[%c0_42, %c0_43, %c0_44, %c0_45] : memref<1x1x3x128xf32, #tpu.memory_space<vmem>>, vector<1x1x3x128xf32>
      tpu.vector_store %arg5[%c0_42, %c0_43, %c0_44, %c0_45], %113 {strides = array<i32>} : memref<1x1x3x128xf32, #tpu.memory_space<vmem>>, vector<1x1x3x128xf32>,
    } else {
    }
    %c0 = arith.constant 0 : index
    %c0_1 = arith.constant 0 : index
    %c0_2 = arith.constant 0 : index
    %3 = vector.load %arg4[%c0, %c0_1, %c0_2] : memref<1x2x128xi32, #tpu.memory_space<vmem>>, vector<1x2x128xi32>
    %4 = vector.shape_cast %3 : vector<1x2x128xi32> to vector<2x128xi32>
    %c0_3 = arith.constant 0 : index
    %c0_4 = arith.constant 0 : index
    %c0_5 = arith.constant 0 : index
    %c0_6 = arith.constant 0 : index
    %5 = vector.load %arg3[%c0_3, %c0_4, %c0_5, %c0_6] : memref<1x3x2x128xf32, #tpu.memory_space<vmem>>, vector<1x1x2x128xf32>
    %6 = vector.shape_cast %5 : vector<1x1x2x128xf32> to vector<2x128xf32>
    %c0_7 = arith.constant 0 : index
    %c1 = arith.constant 1 : index
    %c0_8 = arith.constant 0 : index
    %c0_9 = arith.constant 0 : index
    %7 = vector.load %arg3[%c0_7, %c1, %c0_8, %c0_9] : memref<1x3x2x128xf32, #tpu.memory_space<vmem>>, vector<1x1x2x128xf32>
    %8 = vector.shape_cast %7 : vector<1x1x2x128xf32> to vector<2x128xf32>
    %c0_10 = arith.constant 0 : index
    %c2 = arith.constant 2 : index
    %c0_11 = arith.constant 0 : index
    %c0_12 = arith.constant 0 : index
    %9 = vector.load %arg3[%c0_10, %c2, %c0_11, %c0_12] : memref<1x3x2x128xf32, #tpu.memory_space<vmem>>, vector<1x1x2x128xf32>
    %10 = vector.shape_cast %9 : vector<1x1x2x128xf32> to vector<2x128xf32>
    %11 = arith.maximumf %6, %8 : vector<2x128xf32>
    %12 = arith.maximumf %11, %10 : vector<2x128xf32>
    %13 = arith.subf %6, %12 : vector<2x128xf32>
    %14 = math.exp %13 : vector<2x128xf32>
    %15 = arith.subf %8, %12 : vector<2x128xf32>
    %16 = math.exp %15 : vector<2x128xf32>
    %17 = arith.subf %10, %12 : vector<2x128xf32>
    %18 = math.exp %17 : vector<2x128xf32>
    %19 = arith.addf %14, %16 : vector<2x128xf32>
    %20 = arith.addf %19, %18 : vector<2x128xf32>
    %21 = tpu.reciprocal %20 : vector<2x128xf32> -> vector<2x128xf32>
    %22 = tpu.iota {dimensions = array<i32: 0>} : vector<3x128xi32>
    %23 = tpu.iota {dimensions = array<i32: 1>} : vector<3x128xi32>
    %cst = arith.constant 0.000000e+00 : f32
    %24 = vector.broadcast %cst : f32 to vector<3x128xf32>
    %25 = arith.mulf %16, %21 : vector<2x128xf32>
    %c1_i32 = arith.constant 1 : i32
    %26 = vector.broadcast %c1_i32 : i32 to vector<2x128xi32>
    %27 = arith.cmpi eq, %4, %26 : vector<2x128xi32>
    %28 = arith.extui %27 : vector<2x128xi1> to vector<2x128xi32>
    %29 = arith.sitofp %28 : vector<2x128xi32> to vector<2x128xf32>
    %30 = arith.mulf %25, %29 : vector<2x128xf32>
    %31 = vector.shape_cast %30 : vector<2x128xf32> to vector<1x2x128xf32>
    %cst_13 = arith.constant dense<0.000000e+00> : vector<1xf32>
    %32 = vector.multi_reduction <add>, %31, %cst_13 [1, 2] : vector<1x2x128xf32> to vector<1xf32>
    %33 = vector.shape_cast %32 : vector<1xf32> to vector<1x1x1xf32>
    %34 = vector.extract %33[0, 0, 0] : f32 from vector<1x1x1xf32>
    %35 = vector.shape_cast %25 : vector<2x128xf32> to vector<1x2x128xf32>
    %cst_14 = arith.constant dense<0.000000e+00> : vector<1xf32>
    %36 = vector.multi_reduction <add>, %35, %cst_14 [1, 2] : vector<1x2x128xf32> to vector<1xf32>
    %37 = vector.shape_cast %36 : vector<1xf32> to vector<1x1x1xf32>
    %38 = vector.extract %37[0, 0, 0] : f32 from vector<1x1x1xf32>
    %39 = vector.shape_cast %29 : vector<2x128xf32> to vector<1x2x128xf32>
    %cst_15 = arith.constant dense<0.000000e+00> : vector<1xf32>
    %40 = vector.multi_reduction <add>, %39, %cst_15 [1, 2] : vector<1x2x128xf32> to vector<1xf32>
    %41 = vector.shape_cast %40 : vector<1xf32> to vector<1x1x1xf32>
    %42 = vector.extract %41[0, 0, 0] : f32 from vector<1x1x1xf32>
    %c1_i32_16 = arith.constant 1 : i32
    %43 = vector.broadcast %c1_i32_16 : i32 to vector<3x128xi32>
    %44 = arith.cmpi eq, %22, %43 : vector<3x128xi32>
    %c0_i32_17 = arith.constant 0 : i32
    %45 = vector.broadcast %c0_i32_17 : i32 to vector<3x128xi32>
    %46 = arith.cmpi eq, %23, %45 : vector<3x128xi32>
    %47 = arith.andi %44, %46 : vector<3x128xi1>
    %cst_18 = arith.constant 0.000000e+00 : f32
    %48 = vector.broadcast %34 : f32 to vector<3x128xf32>
    %49 = vector.broadcast %cst_18 : f32 to vector<3x128xf32>
    %50 = arith.select %47, %48, %49 : vector<3x128xi1>, vector<3x128xf32>
    %51 = arith.addf %24, %50 : vector<3x128xf32>
    %c1_i32_19 = arith.constant 1 : i32
    %52 = vector.broadcast %c1_i32_19 : i32 to vector<3x128xi32>
    %53 = arith.cmpi eq, %23, %52 : vector<3x128xi32>
    %54 = arith.andi %44, %53 : vector<3x128xi1>
    %cst_20 = arith.constant 0.000000e+00 : f32
    %55 = vector.broadcast %38 : f32 to vector<3x128xf32>
    %56 = vector.broadcast %cst_20 : f32 to vector<3x128xf32>
    %57 = arith.select %54, %55, %56 : vector<3x128xi1>, vector<3x128xf32>
    %58 = arith.addf %51, %57 : vector<3x128xf32>
    %c2_i32 = arith.constant 2 : i32
    %59 = vector.broadcast %c2_i32 : i32 to vector<3x128xi32>
    %60 = arith.cmpi eq, %23, %59 : vector<3x128xi32>
    %61 = arith.andi %44, %60 : vector<3x128xi1>
    %cst_21 = arith.constant 0.000000e+00 : f32
    %62 = vector.broadcast %42 : f32 to vector<3x128xf32>
    %63 = vector.broadcast %cst_21 : f32 to vector<3x128xf32>
    %64 = arith.select %61, %62, %63 : vector<3x128xi1>, vector<3x128xf32>
    %65 = arith.addf %58, %64 : vector<3x128xf32>
    %66 = arith.mulf %18, %21 : vector<2x128xf32>
    %c2_i32_22 = arith.constant 2 : i32
    %67 = vector.broadcast %c2_i32_22 : i32 to vector<2x128xi32>
    %68 = arith.cmpi eq, %4, %67 : vector<2x128xi32>
    %69 = arith.extui %68 : vector<2x128xi1> to vector<2x128xi32>
    %70 = arith.sitofp %69 : vector<2x128xi32> to vector<2x128xf32>
    %71 = arith.mulf %66, %70 : vector<2x128xf32>
    %72 = vector.shape_cast %71 : vector<2x128xf32> to vector<1x2x128xf32>
    %cst_23 = arith.constant dense<0.000000e+00> : vector<1xf32>
    %73 = vector.multi_reduction <add>, %72, %cst_23 [1, 2] : vector<1x2x128xf32> to vector<1xf32>
    %74 = vector.shape_cast %73 : vector<1xf32> to vector<1x1x1xf32>
    %75 = vector.extract %74[0, 0, 0] : f32 from vector<1x1x1xf32>
    %76 = vector.shape_cast %66 : vector<2x128xf32> to vector<1x2x128xf32>
    %cst_24 = arith.constant dense<0.000000e+00> : vector<1xf32>
    %77 = vector.multi_reduction <add>, %76, %cst_24 [1, 2] : vector<1x2x128xf32> to vector<1xf32>
    %78 = vector.shape_cast %77 : vector<1xf32> to vector<1x1x1xf32>
    %79 = vector.extract %78[0, 0, 0] : f32 from vector<1x1x1xf32>
    %80 = vector.shape_cast %70 : vector<2x128xf32> to vector<1x2x128xf32>
    %cst_25 = arith.constant dense<0.000000e+00> : vector<1xf32>
    %81 = vector.multi_reduction <add>, %80, %cst_25 [1, 2] : vector<1x2x128xf32> to vector<1xf32>
    %82 = vector.shape_cast %81 : vector<1xf32> to vector<1x1x1xf32>
    %83 = vector.extract %82[0, 0, 0] : f32 from vector<1x1x1xf32>
    %c2_i32_26 = arith.constant 2 : i32
    %84 = vector.broadcast %c2_i32_26 : i32 to vector<3x128xi32>
    %85 = arith.cmpi eq, %22, %84 : vector<3x128xi32>
    %c0_i32_27 = arith.constant 0 : i32
    %86 = vector.broadcast %c0_i32_27 : i32 to vector<3x128xi32>
    %87 = arith.cmpi eq, %23, %86 : vector<3x128xi32>
    %88 = arith.andi %85, %87 : vector<3x128xi1>
    %cst_28 = arith.constant 0.000000e+00 : f32
    %89 = vector.broadcast %75 : f32 to vector<3x128xf32>
    %90 = vector.broadcast %cst_28 : f32 to vector<3x128xf32>
    %91 = arith.select %88, %89, %90 : vector<3x128xi1>, vector<3x128xf32>
    %92 = arith.addf %65, %91 : vector<3x128xf32>
    %c1_i32_29 = arith.constant 1 : i32
    %93 = vector.broadcast %c1_i32_29 : i32 to vector<3x128xi32>
    %94 = arith.cmpi eq, %23, %93 : vector<3x128xi32>
    %95 = arith.andi %85, %94 : vector<3x128xi1>
    %cst_30 = arith.constant 0.000000e+00 : f32
    %96 = vector.broadcast %79 : f32 to vector<3x128xf32>
    %97 = vector.broadcast %cst_30 : f32 to vector<3x128xf32>
    %98 = arith.select %95, %96, %97 : vector<3x128xi1>, vector<3x128xf32>
    %99 = arith.addf %92, %98 : vector<3x128xf32>
    %c2_i32_31 = arith.constant 2 : i32
    %100 = vector.broadcast %c2_i32_31 : i32 to vector<3x128xi32>
    %101 = arith.cmpi eq, %23, %100 : vector<3x128xi32>
    %102 = arith.andi %85, %101 : vector<3x128xi1>
    %cst_32 = arith.constant 0.000000e+00 : f32
    %103 = vector.broadcast %83 : f32 to vector<3x128xf32>
    %104 = vector.broadcast %cst_32 : f32 to vector<3x128xf32>
    %105 = arith.select %102, %103, %104 : vector<3x128xi1>, vector<3x128xf32>
    %106 = arith.addf %99, %105 : vector<3x128xf32>
    %c0_33 = arith.constant 0 : index
    %c0_34 = arith.constant 0 : index
    %c0_35 = arith.constant 0 : index
    %c0_36 = arith.constant 0 : index
    %107 = vector.load %arg5[%c0_33, %c0_34, %c0_35, %c0_36] : memref<1x1x3x128xf32, #tpu.memory_space<vmem>>, vector<1x1x3x128xf32>
    %108 = vector.shape_cast %107 : vector<1x1x3x128xf32> to vector<3x128xf32>
    %109 = arith.addf %108, %106 : vector<3x128xf32>
    %c0_37 = arith.constant 0 : index
    %c0_38 = arith.constant 0 : index
    %c0_39 = arith.constant 0 : index
    %c0_40 = arith.constant 0 : index
    %110 = vector.load %arg5[%c0_37, %c0_38, %c0_39, %c0_40] : memref<1x1x3x128xf32, #tpu.memory_space<vmem>>, vector<1x1x3x128xf32>
    %111 = vector.shape_cast %110 : vector<1x1x3x128xf32> to vector<3x128xf32>
    %112 = vector.shape_cast %109 : vector<3x128xf32> to vector<1x1x3x128xf32>
    tpu.vector_store %arg5[%c0_37, %c0_38, %c0_39, %c0_40], %112 {strides = array<i32>} : memref<1x1x3x128xf32, #tpu.memory_space<vmem>>, vector<1x1x3x128xf32>,
    return
  }
  func.func @transform_0(%arg0: i32, %arg1: i32, %arg2: i32) -> (i32, i32, i32, i32) {
    %c1_i32 = arith.constant 1 : i32
    %0 = arith.muli %arg0, %c1_i32 : i32
    %1 = arith.addi %0, %arg2 : i32
    %c0_i32 = arith.constant 0 : i32
    %c0_i32_0 = arith.constant 0 : i32
    %c0_i32_1 = arith.constant 0 : i32
    return %arg1, %c0_i32, %1, %c0_i32_0 : i32, i32, i32, i32
  }
  func.func @transform_1(%arg0: i32, %arg1: i32, %arg2: i32) -> (i32, i32, i32) {
    %c1_i32 = arith.constant 1 : i32
    %0 = arith.muli %arg0, %c1_i32 : i32
    %1 = arith.addi %0, %arg2 : i32
    %c0_i32 = arith.constant 0 : i32
    %c0_i32_0 = arith.constant 0 : i32
    return %arg1, %1, %c0_i32 : i32, i32, i32
  }
  func.func @transform_2(%arg0: i32, %arg1: i32, %arg2: i32) -> (i32, i32, i32, i32) {
    %c0_i32 = arith.constant 0 : i32
    %c0_i32_0 = arith.constant 0 : i32
    %c0_i32_1 = arith.constant 0 : i32
    return %arg0, %arg1, %c0_i32, %c0_i32_0 : i32, i32, i32, i32
  }
}

</mosaic_0001>

<bundles_post_ra>
// kernel: dice_loss.1
= control target key start
LH: loop header
LB: loop body
LE: loop exit
PB: predicated region body
PF: predicated region fallthrough
CT: control target
= control target key end

     0   :  { %s570_s9 = smov 0   ;;  %s572_s10 = smov 0   ;;  %s626_s0 = inlined_call_operand.vmem [shape: f32[2,3,2,128], index: 0, kind: input, shape index: {}]   ;;  %s627_s1 = inlined_call_operand.vmem [shape: s32[2,2,128], index: 1, kind: input, shape index: {}]   ;;  %s628_s2 = inlined_call_operand.vmem [shape: f32[1,2,3,128], index: 2, kind: output, shape index: {}]  }
   0x1   :  { %s574_s11 = smov 0  }
   0x2 LB: > { %s27_s12 = sadd.s32 1, %s548_s10  ;;  %p474_p0 = scmp.ge.s32.totalorder %s552_s11, 1  ;;  %s552_s11 = sphi %s574_s11, %s12_s11   ;;  %s548_s10 = sphi %s572_s10, %s630_s10   ;;  %s544_s9 = sphi %s570_s9, %s629_s9  }
   0x3   : > { %p29_p1 = scmp.ge.s32.totalorder %s27_s12, 2  ;;  %p160_p2 = scmp.lt.s32.totalorder %s552_s11, 3 }
   0x5   : > { %s632_s12 = smov (%p29_p1, %s27_s12), 0  ;;  %p161_p3 = pnand %p474_p0, %p160_p2 }
   0x6   : > { %p198_p4 = scmp.lt.s32.totalorder (!%p161_p3), %s544_s9, 1 }
   0x7   : > { %164 = sbr.rel (%p161_p3) target bundleno = 263 (0x107), region = 28 }
   0xc   : > { %s634_s9 = smov (!%p198_p4, %s544_s9), 1  ;;  %v554_v0 = vmov 0.0   ;;  %vm271_vm0 = vcmask 1041408  }
   0xd   : > { %s476_s13 = sshll.u32 %s634_s9, 1  ;;  %s477_s14 = sshll.u32 %s634_s9, 2 }
   0xe   : > { %s214_s17 = scalar_lea.vmem %s627_s1, %s476_s13  ;;  %s594_s20 = scalar_lea.vmem %s628_s2, %s477_s14 }
   0xf   : > { %228 = vst [vmem:[%s594_s20] sm:$0x7] %v554_v0  ;;  %v229_v1 = vld [vmem:[%s214_s17] sm:$0x3]  ;;  %s484_s21 = smul.u32 6, %s634_s9 }
  0x10   : > { %vm267_vm1 = vcmp.eq.s32.totalorder %v229_v1, 1  ;;  %vm319_vm5 = vcmp.eq.s32.totalorder %v229_v1, 2 }
  0x11   : > { %v480_v2 = vsel %vm267_vm1, 1.0, %v554_v0  ;;  %s205_s24 = scalar_lea.vmem %s626_s0, %s484_s21  ;;  %v481_v30 = vsel %vm319_vm5, 1.0, %v554_v0 }
  0x12   : > { %v292_v3 = vsel %vm271_vm0, %v480_v2, 0.0  ;;  %v230_v4 = vld [vmem:[%s205_s24] sm:$0x3]  ;;  %v479_v5 = vld [vmem:[%s205_s24 + $0x4] sm:$0x3]  ;;  %v343_v38 = vsel %vm271_vm0, %v481_v30, 0.0 }
  0x13   : > { %293 = vadd.xlane.f32.xlu1 %v292_v3  ;;  %v478_v6 = vld [vmem:[%s205_s24 + $0x2] sm:$0x3] }
  0x14   : > { %v235_v7 = vmax.f32 %v230_v4, %v478_v6 }
  0x16   : > { %v236_v8 = vmax.f32 %v235_v7, %v479_v5 }
  0x18   : > { %v237_v9 = vsub.f32 %v230_v4, %v236_v8  ;;  %v240_v10 = vsub.f32 %v478_v6, %v236_v8  ;;  %v243_v11 = vsub.f32 %v479_v5, %v236_v8 }
  0x1a   : > { %v238_v12 = vmul.f32 1.442695, %v237_v9  ;;  %v241_v13 = vmul.f32 1.442695, %v240_v10  ;;  %v244_v14 = vmul.f32 1.442695, %v243_v11 }
  0x1c   : > { %522 = vpow2.f32 %v238_v12 }
  0x1d   : > { %524 = vpow2.f32 %v241_v13 }
  0x1e   : > { %526 = vpow2.f32 %v244_v14 }
  0x22   : > { %v523_v15 = vpop.eup %522 }
  0x23   : > { %v525_v16 = vpop.eup %524 }
  0x24   : > { %v527_v17 = vpop.eup %526  ;;  %v246_v18 = vadd.f32 %v525_v16, %v523_v15 }
  0x26   : > { %v247_v19 = vadd.f32 %v527_v17, %v246_v18  ;;  %v262_v18 = vlaneseq }
  0x28   : > { %528 = vrcp.f32 %v247_v19  ;;  %v259_v22 = vand.u32 2147483648, %v247_v19  ;;  %vm253_vm2 = vweird.f32 %v247_v19  ;;  %v257_v24 = vand.u32 2147483647, %v247_v19 }
  0x2a   : > { %v260_v26 = vor.u32 1.1754944e-38, %v259_v22  ;;  %vm258_vm6 = vcmp.eq.f32.partialorder %v257_v24, 8.507059e+37 }
  0x2e   : > { %v529_v20 = vpop.eup %528 }
  0x2f   : > { %v249_v21 = vmul.f32 %v529_v20, %v247_v19  ;;  %vm254_vm3 = vweird.f32 %v529_v20  ;;  %v263_v19 = vshrl.u32 %v262_v18, 7 }
  0x30   : > { %vm255_vm4 = vmor %vm253_vm2, %vm254_vm3 }
  0x31   : > { %v250_v23 = vsub.f32 1.0, %v249_v21  ;;  %vm302_vm7 = vcmp.eq.s32.totalorder %v263_v19, 1  ;;  %vm353_vm13 = vcmp.eq.s32.totalorder %v263_v19, 2 }
  0x33   : > { %v251_v25 = vmul.f32 %v529_v20, %v250_v23 }
  0x35   : > { %v252_v27 = vadd.f32 %v529_v20, %v251_v25 }
  0x37   : > { %v256_v28 = vsel %vm255_vm4, %v529_v20, %v252_v27  ;;  %v265_v20 = vand.u32 127, %v262_v18 }
  0x38   : > { %v261_v29 = vsel %vm258_vm6, %v260_v26, %v256_v28 }
  0x39   : > { %v266_v31 = vmul.f32 %v525_v16, %v261_v29  ;;  %v318_v32 = vmul.f32 %v527_v17, %v261_v29  ;;  %vm303_vm8 = vcmp.eq.s32.totalorder %v265_v20, 0  ;;  %vm308_vm9 = vcmp.eq.s32.totalorder %v265_v20, 1 }
  0x3a   : > { %vm304_vm10 = vmand %vm302_vm7, %vm303_vm8  ;;  %vm313_vm11 = vcmp.eq.s32.totalorder %v265_v20, 2 }
  0x3b   : > { %v270_v33 = vmul.f32 %v480_v2, %v266_v31  ;;  %v333_v34 = vsel %vm271_vm0, %v318_v32, 0.0  ;;  %v322_v35 = vmul.f32 %v481_v30, %v318_v32  ;;  %v282_v39 = vsel %vm271_vm0, %v266_v31, 0.0  ;;  %vm309_vm12 = vmand %vm302_vm7, %vm308_vm9 }
  0x3c   : > { %334 = vadd.xlane.f32.xlu2 %v333_v34  ;;  %vm314_vm14 = vmand %vm302_vm7, %vm313_vm11 }
  0x3d   : > { %v272_v36 = vsel %vm271_vm0, %v270_v33, 0.0  ;;  %v323_v37 = vsel %vm271_vm0, %v322_v35, 0.0  ;;  %vm354_vm15 = vmand %vm353_vm13, %vm303_vm8 }
  0x3e   : > { %273 = vadd.xlane.f32.xlu0 %v272_v36  ;;  %324 = vadd.xlane.f32.xlu1 %v323_v37  ;;  %vm358_vm0 = vmand %vm353_vm13, %vm308_vm9  ;;  %v366_v37 = vld [vmem:[%s594_s20] sm:$0x7] }
  0x3f   : > { %vm362_vm1 = vmand %vm353_vm13, %vm313_vm11 }
  0x44   : > { %344 = vadd.xlane.f32.xlu2 %v343_v38 }
  0x46   : > { %283 = vadd.xlane.f32.xlu0 %v282_v39 }
  0x86   : > { %v294_v40 = vpop.xlane.xlu1 %293 }
  0x87   : > { %v295_v42 = vrot.slane %v294_v40, 4 }
  0x89   : > { %v296_v49 = vadd.f32 %v295_v42, %v294_v40 }
  0x8b   : > { %v297_v56 = vrot.slane %v296_v49, 2 }
  0x8d   : > { %v298_v2 = vadd.f32 %v297_v56, %v296_v49 }
  0x8f   : > { %v299_v8 = vrot.slane %v298_v2, 1 }
  0x91   : > { %v300_v14 = vadd.f32 %v299_v8, %v298_v2 }
  0xaf   : > { %v335_v41 = vpop.xlane.xlu2 %334 }
  0xb0   : > { %v336_v47 = vrot.slane %v335_v41, 4 }
  0xb1   : > { %v274_v43 = vpop.xlane.xlu0 %273  ;;  %v325_v44 = vpop.xlane.xlu1 %324 }
  0xb2   : > { %v275_v45 = vrot.slane %v274_v43, 4  ;;  %v326_v46 = vrot.slane %v325_v44, 4  ;;  %v337_v52 = vadd.f32 %v336_v47, %v335_v41 }
  0xb4   : > { %v276_v48 = vadd.f32 %v275_v45, %v274_v43  ;;  %v327_v51 = vadd.f32 %v326_v46, %v325_v44  ;;  %v338_v62 = vrot.slane %v337_v52, 2 }
  0xb6   : > { %v277_v50 = vrot.slane %v276_v48, 2  ;;  %v328_v58 = vrot.slane %v327_v51, 2  ;;  %v339_v6 = vadd.f32 %v338_v62, %v337_v52 }
  0xb7   : > { %v345_v53 = vpop.xlane.xlu2 %344 }
  0xb8   : > { %v346_v54 = vrot.slane %v345_v53, 4  ;;  %v278_v55 = vadd.f32 %v277_v50, %v276_v48  ;;  %v329_v3 = vadd.f32 %v328_v58, %v327_v51  ;;  %v340_v12 = vrot.slane %v339_v6, 1 }
  0xb9   : > { %v284_v57 = vpop.xlane.xlu0 %283 }
  0xba   : > { %v285_v59 = vrot.slane %v284_v57, 4  ;;  %v347_v60 = vadd.f32 %v346_v54, %v345_v53  ;;  %v279_v61 = vrot.slane %v278_v55, 1  ;;  %v330_v10 = vrot.slane %v329_v3, 1 }
  0xbb   : > { %v341_v17 = vadd.f32 %v340_v12, %v339_v6 }
  0xbc   : > { %v286_v63 = vadd.f32 %v285_v59, %v284_v57  ;;  %v348_v0 = vrot.slane %v347_v60, 2  ;;  %v280_v1 = vadd.f32 %v279_v61, %v278_v55  ;;  %v331_v15 = vadd.f32 %v330_v10, %v329_v3 }
  0xbe   : > { %v287_v4 = vrot.slane %v286_v63, 2  ;;  %v349_v5 = vadd.f32 %v348_v0, %v347_v60  ;;  %485 = vpush %v280_v1 }
  0xc0   : > { %v288_v7 = vadd.f32 %v287_v4, %v286_v63  ;;  %v350_v11 = vrot.slane %v349_v5, 1 }
  0xc2   : > { %v289_v9 = vrot.slane %v288_v7, 1  ;;  %v351_v16 = vadd.f32 %v350_v11, %v349_v5 }
  0xc4   : > { %v290_v13 = vadd.f32 %v289_v9, %v288_v7 }
  0xc6   : > { %487 = vpush %v290_v13 }
  0xc7   : > { %489 = vpush %v300_v14 }
  0xc8   : > { %491 = vpush %v331_v15 }
  0xc9   : > { %493 = vpush %v341_v17 }
  0xca   : > { %495 = vpush %v351_v16 }
  0xef   : > { %s486_s25 = spop %485 }
  0xf0   : > { %v305_v21 = vstv %s486_s25 }
  0xf1   : > { %v306_v23 = vsel %vm304_vm10, %v305_v21, 0.0 }
  0xf7   : > { %s488_s26 = spop %487 }
  0xf8   : > { %v310_v22 = vstv %s488_s26  ;;  %s490_s27 = spop %489 }
  0xf9   : > { %v311_v24 = vsel %vm309_vm12, %v310_v22, 0.0  ;;  %v315_v25 = vstv %s490_s27  ;;  %s492_s28 = spop %491 }
  0xfa   : > { %v312_v26 = vadd.f32 %v311_v24, %v306_v23  ;;  %v355_v27 = vstv %s492_s28  ;;  %s494_s29 = spop %493  ;;  %v316_v28 = vsel %vm314_vm14, %v315_v25, 0.0 }
  0xfb   : > { %s496_s30 = spop %495  ;;  %v359_v30 = vstv %s494_s29  ;;  %v356_v31 = vsel %vm354_vm15, %v355_v27, 0.0 }
  0xfc   : > { %v317_v29 = vadd.f32 %v316_v28, %v312_v26  ;;  %v363_v33 = vstv %s496_s30  ;;  %v360_v34 = vsel %vm358_vm0, %v359_v30, 0.0 }
  0xfd   : > { %v364_v36 = vsel %vm362_vm1, %v363_v33, 0.0 }
  0xfe   : > { %v357_v32 = vadd.f32 %v356_v31, %v317_v29 }
 0x100   : > { %v361_v35 = vadd.f32 %v360_v34, %v357_v32 }
 0x102   : > { %v365_v38 = vadd.f32 %v364_v36, %v361_v35 }
 0x104   : > { %v367_v39 = vadd.f32 %v366_v37, %v365_v38 }
 0x106   : > { %368 = vst [vmem:[%s594_s20] sm:$0x7] %v367_v39 }
 0x107 PF: > { %s12_s11 = sadd.s32 1, %s552_s11   ;;  %s629_s9 = smov %s548_s10 }
 0x108   : > { %p9_p5 = scmp.ge.s32.totalorder %s12_s11, 4   ;;  %s630_s10 = smov %s632_s12 }
 0x10a   :  { %11 = sbr.rel (!%p9_p5) target bundleno = 2 (0x2), region = 67 }

</bundles_post_ra>
